<compile_context>
chip_gen: v6e
topology: v6e:2x2x1
jax: 0.10.0
libtpu: 0.0.40
codegen_flags: <defaults>
</compile_context>

<pallas_src>
import functools

import jax
import jax.numpy as jnp
from jax.experimental import pallas as pl
from jax.experimental.pallas import tpu as pltpu


# ----------------------------------------------------------------------------
# Fused single-pass kernel (per-batch slab resident in VMEM)
# ----------------------------------------------------------------------------
def _cam_fused_kernel(x_ref, w1_ref, w2_ref, o_ref, *, hw_total):
    """x_ref: (1, C, HW); w1_ref: (Cr, C); w2_ref: (C, Cr); o_ref: (1, C, HW)."""
    x = x_ref[0].astype(jnp.float32)                                  # (C, HW)
    s = jnp.sum(x, axis=1, keepdims=True)                             # (C, 1)
    m = jnp.max(x, axis=1, keepdims=True)                             # (C, 1)
    avg = s * (1.0 / hw_total)

    def mlp(p):                                                       # p: (C, 1)
        h = jnp.dot(w1_ref[...], p, preferred_element_type=jnp.float32)
        h = jnp.maximum(h, 0.0)                                       # ReLU, (Cr, 1)
        return jnp.dot(w2_ref[...], h, preferred_element_type=jnp.float32)

    att = jax.nn.sigmoid(mlp(avg) + mlp(m))                           # (C, 1)
    o_ref[0] = (x * att).astype(o_ref.dtype)


# ----------------------------------------------------------------------------
# Two-pass tiled kernels (fallback for large C*HW)
# ----------------------------------------------------------------------------
def _cam_reduce_kernel(x_ref, w1_ref, w2_ref, att_ref, sum_acc, max_acc, *, hw_total):
    """Accumulate per-channel spatial sum/max; at the last spatial tile run the
    shared MLP on both pooled vectors and emit sigmoid(avg_out + max_out).

    x_ref   : (1, C, TILE_HW)  input tile (channels on sublanes, spatial on lanes)
    att_ref : (1, C, 1)        per-batch attention column (written at last tile)
    sum_acc : (C, 1) VMEM      running spatial sum
    max_acc : (C, 1) VMEM      running spatial max
    """
    t = pl.program_id(1)

    @pl.when(t == 0)
    def _():
        sum_acc[...] = jnp.zeros_like(sum_acc)
        max_acc[...] = jnp.full_like(max_acc, -jnp.inf)

    x = x_ref[0].astype(jnp.float32)                                  # (C, TILE_HW)
    sum_acc[...] = sum_acc[...] + jnp.sum(x, axis=1, keepdims=True)
    max_acc[...] = jnp.maximum(max_acc[...], jnp.max(x, axis=1, keepdims=True))

    @pl.when(t == pl.num_programs(1) - 1)
    def _():
        avg = sum_acc[...] * (1.0 / hw_total)                         # (C, 1)
        mx = max_acc[...]                                             # (C, 1)

        def mlp(p):                                                   # p: (C, 1)
            h = jnp.dot(w1_ref[...], p, preferred_element_type=jnp.float32)
            h = jnp.maximum(h, 0.0)
            return jnp.dot(w2_ref[...], h, preferred_element_type=jnp.float32)

        att = jax.nn.sigmoid(mlp(avg) + mlp(mx))                      # (C, 1)
        att_ref[0] = att.astype(att_ref.dtype)


def _cam_apply_kernel(x_ref, att_ref, o_ref):
    """o = x * atten (broadcast per-channel attention over the spatial lanes)."""
    x = x_ref[0].astype(jnp.float32)                                  # (C, TILE_HW)
    att = att_ref[0]                                                  # (C, 1) f32
    o_ref[0] = (x * att).astype(o_ref.dtype)


# ----------------------------------------------------------------------------
# Wrapper
# ----------------------------------------------------------------------------
def _pick_hw_tile(hw, c, bytes_per_elem=4, budget=2 * 1024 * 1024):
    """Largest multiple-of-128 divisor of hw whose (c, tile) f32 slab fits budget."""
    if hw % 128 != 0:
        return hw                       # full-extent block is always allowed
    max_lanes = max(128, (budget // (c * bytes_per_elem)) // 128 * 128)
    t = min(hw, max_lanes)
    while hw % t != 0:
        t -= 128
    return max(t, 128)


def cam_forward(x_nchw, w_fc1, w_fc2, *, force_two_pass=False):
    """CAM forward.  x: (N, C, H, W); w_fc1: (Cr, C, 1, 1); w_fc2: (C, Cr, 1, 1)."""
    N, C, H, W = x_nchw.shape
    Cr = w_fc1.shape[0]
    HW = H * W

    xf = x_nchw.reshape(N, C, HW)                 # free reshape, native dtype in HBM
    w1 = w_fc1.reshape(Cr, C).astype(jnp.float32)
    w2 = w_fc2.reshape(C, Cr).astype(jnp.float32)

    slab_bytes = C * HW * 4
    use_fused = (not force_two_pass) and slab_bytes <= 4 * 1024 * 1024

    if use_fused:
        # Single pass: 1x HBM read + 1x HBM write per element.
        out = pl.pallas_call(
            functools.partial(_cam_fused_kernel, hw_total=float(HW)),
            out_shape=jax.ShapeDtypeStruct((N, C, HW), x_nchw.dtype),
            grid=(N,),
            in_specs=[
                pl.BlockSpec((1, C, HW), lambda n: (n, 0, 0)),
                pl.BlockSpec((Cr, C), lambda n: (0, 0)),
                pl.BlockSpec((C, Cr), lambda n: (0, 0)),
            ],
            out_specs=pl.BlockSpec((1, C, HW), lambda n: (n, 0, 0)),
            compiler_params=pltpu.CompilerParams(
                dimension_semantics=("parallel",),
                vmem_limit_bytes=32 * 1024 * 1024),
        )(xf, w1, w2)
        return out.reshape(N, C, H, W)

    # ---------------- two-pass tiled fallback ----------------
    tile_hw = _pick_hw_tile(HW, C)
    n_tiles = HW // tile_hw

    # Pass 1: pooled stats + shared MLP + sigmoid -> per-batch attention (N, C, 1)
    att = pl.pallas_call(
        functools.partial(_cam_reduce_kernel, hw_total=float(HW)),
        out_shape=jax.ShapeDtypeStruct((N, C, 1), jnp.float32),
        grid=(N, n_tiles),
        in_specs=[
            pl.BlockSpec((1, C, tile_hw), lambda n, t: (n, 0, t)),
            pl.BlockSpec((Cr, C), lambda n, t: (0, 0)),
            pl.BlockSpec((C, Cr), lambda n, t: (0, 0)),
        ],
        out_specs=pl.BlockSpec((1, C, 1), lambda n, t: (n, 0, 0)),
        scratch_shapes=[pltpu.VMEM((C, 1), jnp.float32),
                        pltpu.VMEM((C, 1), jnp.float32)],
        compiler_params=pltpu.CompilerParams(
            dimension_semantics=("parallel", "arbitrary")),
    )(xf, w1, w2)

    # Pass 2: scale every lane-dense spatial tile by the (C, 1) attention column.
    out = pl.pallas_call(
        _cam_apply_kernel,
        out_shape=jax.ShapeDtypeStruct((N, C, HW), x_nchw.dtype),
        grid=(N, n_tiles),
        in_specs=[
            pl.BlockSpec((1, C, tile_hw), lambda n, t: (n, 0, t)),
            pl.BlockSpec((1, C, 1), lambda n, t: (n, 0, 0)),
        ],
        out_specs=pl.BlockSpec((1, C, tile_hw), lambda n, t: (n, 0, t)),
        compiler_params=pltpu.CompilerParams(
            dimension_semantics=("parallel", "parallel")),
    )(xf, att)

    return out.reshape(N, C, H, W)


# ----------------------------------------------------------------------------
# Pure-JAX reference (for correctness check)
# ----------------------------------------------------------------------------
def cam_reference(x, w_fc1, w_fc2):
    N, C, H, W = x.shape
    Cr = w_fc1.shape[0]
    W1 = w_fc1.reshape(Cr, C)
    W2 = w_fc2.reshape(C, Cr)

    avg = jnp.mean(x, axis=(2, 3))                                    # (N, C)
    mx = jnp.max(x, axis=(2, 3))                                      # (N, C)

    def mlp(p):                                                       # (N, C)
        h = jnp.maximum(p @ W1.T, 0.0)                                # (N, Cr)
        return h @ W2.T                                               # (N, C)

    att = jax.nn.sigmoid(mlp(avg) + mlp(mx))                          # (N, C)
    return x * att[:, :, None, None]


# ----------------------------------------------------------------------------
# Main
# ----------------------------------------------------------------------------
if __name__ == "__main__":
    key = jax.random.PRNGKey(0)
    N, C, H, W = 2, 32, 16, 16          # in_planes must be >= 16 (ratio-16 squeeze)
    Cr = max(C // 16, 1)

    ks = jax.random.split(key, 3)
    x = jax.random.normal(ks[0], (N, C, H, W), jnp.float32)
    w_fc1 = jax.random.normal(ks[1], (Cr, C, 1, 1), jnp.float32) * 0.2
    w_fc2 = jax.random.normal(ks[2], (C, Cr, 1, 1), jnp.float32) * 0.2

    ref = cam_reference(x, w_fc1, w_fc2)

    # Fused single-pass path (default for this shape).
    out = jax.block_until_ready(cam_forward(x, w_fc1, w_fc2))
    # Also exercise the tiled two-pass fallback for robustness.
    out_tiled = jax.block_until_ready(cam_forward(x, w_fc1, w_fc2, force_two_pass=True))

    err_fused = float(jnp.max(jnp.abs(out - ref)))
    err_tiled = float(jnp.max(jnp.abs(out_tiled - ref)))
    assert out.shape == (N, C, H, W), out.shape
    assert err_fused < 1e-4, f"fused max abs err {err_fused}"
    assert err_tiled < 1e-4, f"tiled max abs err {err_tiled}"
    print("KERNEL_OK")
</pallas_src>

<mosaic_0001>
module attributes {stable_mosaic.version = 11 : i64} {
  func.func @_cam_fused_kernel(%arg0: i32, %arg1: memref<1x32x256xf32, #tpu.memory_space<vmem>>, %arg2: memref<2x32xf32, #tpu.memory_space<vmem>>, %arg3: memref<32x2xf32, #tpu.memory_space<vmem>>, %arg4: memref<1x32x256xf32, #tpu.memory_space<vmem>>) attributes {dimension_semantics = [#tpu.dimension_semantics<parallel>], iteration_bounds = array<i64: 2>, scalar_prefetch = 0 : i64, scratch_operands = 0 : i64, tpu.core_type = #tpu.core_type<tc>, window_params = [{transform_indices = @transform_0, window_bounds = array<i64: 1, 32, 256>}, {pipeline_mode = #tpu.pipeline_mode<synchronous>, transform_indices = @transform_1, window_bounds = array<i64: 2, 32>}, {pipeline_mode = #tpu.pipeline_mode<synchronous>, transform_indices = @transform_2, window_bounds = array<i64: 32, 2>}, {transform_indices = @transform_3, window_bounds = array<i64: 1, 32, 256>}]} {
    %c0 = arith.constant 0 : index
    %c0_0 = arith.constant 0 : index
    %c0_1 = arith.constant 0 : index
    %0 = vector.load %arg1[%c0, %c0_0, %c0_1] : memref<1x32x256xf32, #tpu.memory_space<vmem>>, vector<1x32x256xf32>
    %1 = vector.shape_cast %0 : vector<1x32x256xf32> to vector<32x256xf32>
    %cst = arith.constant dense<0.000000e+00> : vector<32xf32>
    %2 = vector.multi_reduction <add>, %1, %cst [1] : vector<32x256xf32> to vector<32xf32>
    %3 = vector.shape_cast %2 : vector<32xf32> to vector<32x1xf32>
    %cst_2 = arith.constant dense<0xFF800000> : vector<32xf32>
    %4 = vector.multi_reduction <maximumf>, %1, %cst_2 [1] : vector<32x256xf32> to vector<32xf32>
    %5 = vector.shape_cast %4 : vector<32xf32> to vector<32x1xf32>
    %cst_3 = arith.constant 3.906250e-03 : f32
    %6 = vector.broadcast %cst_3 : f32 to vector<32x1xf32>
    %7 = arith.mulf %3, %6 : vector<32x1xf32>
    %c0_4 = arith.constant 0 : index
    %c0_5 = arith.constant 0 : index
    %8 = vector.load %arg2[%c0_4, %c0_5] : memref<2x32xf32, #tpu.memory_space<vmem>>, vector<2x32xf32>
    %cst_6 = arith.constant dense<0.000000e+00> : vector<2x1xf32>
    %9 = tpu.matmul %8, %7, %cst_6 {dimension_numbers = #tpu.dot_dimension_numbers<[1], [0], [0], [1], [0, 0, 1, 1], [], []>} : vector<2x32xf32>, vector<32x1xf32>, vector<2x1xf32> -> vector<2x1xf32>
    %cst_7 = arith.constant 0.000000e+00 : f32
    %10 = vector.broadcast %cst_7 : f32 to vector<2x1xf32>
    %11 = arith.maximumf %9, %10 : vector<2x1xf32>
    %c0_8 = arith.constant 0 : index
    %c0_9 = arith.constant 0 : index
    %12 = vector.load %arg3[%c0_8, %c0_9] : memref<32x2xf32, #tpu.memory_space<vmem>>, vector<32x2xf32>
    %cst_10 = arith.constant dense<0.000000e+00> : vector<32x1xf32>
    %13 = tpu.matmul %12, %11, %cst_10 {dimension_numbers = #tpu.dot_dimension_numbers<[1], [0], [0], [1], [0, 0, 1, 1], [], []>} : vector<32x2xf32>, vector<2x1xf32>, vector<32x1xf32> -> vector<32x1xf32>
    %c0_11 = arith.constant 0 : index
    %c0_12 = arith.constant 0 : index
    %14 = vector.load %arg2[%c0_11, %c0_12] : memref<2x32xf32, #tpu.memory_space<vmem>>, vector<2x32xf32>
    %cst_13 = arith.constant dense<0.000000e+00> : vector<2x1xf32>
    %15 = tpu.matmul %14, %5, %cst_13 {dimension_numbers = #tpu.dot_dimension_numbers<[1], [0], [0], [1], [0, 0, 1, 1], [], []>} : vector<2x32xf32>, vector<32x1xf32>, vector<2x1xf32> -> vector<2x1xf32>
    %cst_14 = arith.constant 0.000000e+00 : f32
    %16 = vector.broadcast %cst_14 : f32 to vector<2x1xf32>
    %17 = arith.maximumf %15, %16 : vector<2x1xf32>
    %c0_15 = arith.constant 0 : index
    %c0_16 = arith.constant 0 : index
    %18 = vector.load %arg3[%c0_15, %c0_16] : memref<32x2xf32, #tpu.memory_space<vmem>>, vector<32x2xf32>
    %cst_17 = arith.constant dense<0.000000e+00> : vector<32x1xf32>
    %19 = tpu.matmul %18, %17, %cst_17 {dimension_numbers = #tpu.dot_dimension_numbers<[1], [0], [0], [1], [0, 0, 1, 1], [], []>} : vector<32x2xf32>, vector<2x1xf32>, vector<32x1xf32> -> vector<32x1xf32>
    %20 = arith.addf %13, %19 : vector<32x1xf32>
    %21 = arith.negf %20 : vector<32x1xf32>
    %22 = math.exp %21 : vector<32x1xf32>
    %cst_18 = arith.constant 1.000000e+00 : f32
    %23 = vector.broadcast %cst_18 : f32 to vector<32x1xf32>
    %24 = arith.addf %23, %22 : vector<32x1xf32>
    %25 = arith.divf %23, %24 : vector<32x1xf32>
    %26 = vector.broadcast %25 : vector<32x1xf32> to vector<32x256xf32>
    %27 = arith.mulf %1, %26 : vector<32x256xf32>
    %c0_19 = arith.constant 0 : index
    %c0_20 = arith.constant 0 : index
    %c0_21 = arith.constant 0 : index
    %28 = vector.load %arg4[%c0_19, %c0_20, %c0_21] : memref<1x32x256xf32, #tpu.memory_space<vmem>>, vector<1x32x256xf32>
    %29 = vector.shape_cast %28 : vector<1x32x256xf32> to vector<32x256xf32>
    %30 = vector.shape_cast %27 : vector<32x256xf32> to vector<1x32x256xf32>
    tpu.vector_store %arg4[%c0_19, %c0_20, %c0_21], %30 {strides = array<i32>} : memref<1x32x256xf32, #tpu.memory_space<vmem>>, vector<1x32x256xf32>,
    return
  }
  func.func @transform_0(%arg0: i32) -> (i32, i32, i32) {
    %c0_i32 = arith.constant 0 : i32
    %c0_i32_0 = arith.constant 0 : i32
    %c0_i32_1 = arith.constant 0 : i32
    return %arg0, %c0_i32, %c0_i32_0 : i32, i32, i32
  }
  func.func @transform_1(%arg0: i32) -> (i32, i32) {
    %c0_i32 = arith.constant 0 : i32
    %c0_i32_0 = arith.constant 0 : i32
    %c0_i32_1 = arith.constant 0 : i32
    return %c0_i32, %c0_i32_0 : i32, i32
  }
  func.func @transform_2(%arg0: i32) -> (i32, i32) {
    %c0_i32 = arith.constant 0 : i32
    %c0_i32_0 = arith.constant 0 : i32
    %c0_i32_1 = arith.constant 0 : i32
    return %c0_i32, %c0_i32_0 : i32, i32
  }
  func.func @transform_3(%arg0: i32) -> (i32, i32, i32) {
    %c0_i32 = arith.constant 0 : i32
    %c0_i32_0 = arith.constant 0 : i32
    %c0_i32_1 = arith.constant 0 : i32
    return %arg0, %c0_i32, %c0_i32_0 : i32, i32, i32
  }
}

</mosaic_0001>

<bundles_post_ra>
// kernel: tpu_custom_call.1
= control target key start
LH: loop header
LB: loop body
LE: loop exit
PB: predicated region body
PF: predicated region fallthrough
CT: control target
= control target key end

     0   :  { %8 = vsyncpa [#allocation3], 0  ;;  %s1218_s0 = inlined_call_operand.hbm [shape: f32[2,32,256], index: 0, kind: input, shape index: {}]   ;;  %s1219_s1 = inlined_call_operand.vmem [shape: f32[2,32], index: 1, kind: input, shape index: {}]   ;;  %s1220_s2 = inlined_call_operand.vmem [shape: f32[32,2], index: 2, kind: input, shape index: {}]   ;;  %s1221_s3 = inlined_call_operand.hbm [shape: f32[2,32,256], index: 3, kind: output, shape index: {}]  }
   0x1   :  { %10 = vsyncpa [#allocation3 + $0x1], 0 }
   0x2   :  { %11 = vsyncpa [#allocation4], 0 }
   0x3   :  { %13 = vsyncpa [#allocation4 + $0x1], 0  ;;  %s997_s12 = smov 0   ;;  %s999_s13 = smov 0  }
   0x4   :  { %s1001_s14 = smov 0   ;;  %s1003_s15 = smov 0  }
   0x5 LB: > { %s1018_s16 = sadd.s32 4294967295, %s966_s15   ;;  %s713_s17 = sadd.s32 4294967294, %s966_s15   ;;  %s966_s15 = sphi %s1003_s15, %s1236_s15   ;;  %s962_s14 = sphi %s1001_s14, %s1235_s14   ;;  %s958_s13 = sphi %s999_s13, %s1234_s13   ;;  %s954_s12 = sphi %s997_s12, %s1233_s12  }
   0x6   : > { %s1022_s18 = sadd.s32 1, %s966_s15   ;;  %s26_s19 = sadd.s32 1, %s962_s14 }
   0x7   : > { %s23_s20 = ssub.s32 %s966_s15, %s1022_s18  ;;  %p33_p0 = scmp.ne.s32.totalorder %s962_s14, %s958_s13 }
   0x8   : > { %p24_p1 = scmp.eq.s32.totalorder %s23_s20, 0  ;;  %p34_p2 = scmp.eq.s32.totalorder %s966_s15, 0 }
   0x9   : > { %p39_p3 = scmp.ne.s32.totalorder %s958_s13, %s954_s12  ;;  %p40_p4 = scmp.eq.s32.totalorder %s1018_s16, 0 }
   0xa   : > { %s1034_s21 = scalar_select %p24_p1, %s962_s14, %s26_s19  }
   0xb   : > { %p1036_p5 = por %p34_p2, %p33_p0  ;;  %p1040_p6 = por %p40_p4, %p39_p3 }
   0xc   : > { %p105_p7 = scmp.eq.s32.totalorder %s1018_s16, 1  ;;  %p111_p8 = scmp.eq.s32.totalorder %s713_s17, 1 }
   0xd   : > { %s1225_s23 = scalar_select %p1040_p6, 1, 0 }
   0xe   : > { %p815_p10 = scmp.lt.s32.totalorder %s966_s15, 2  ;;  %p1047_p11 = por %p105_p7, %p33_p0 }
   0xf   : > { %p1051_p12 = por %p111_p8, %p39_p3  ;;  %s137_s26 = sand.u32 1, %s962_s14  }
  0x10   : > { %s1226_s24 = scalar_select %p1047_p11, 1, 0 }
  0x11   : > { %s1227_s25 = scalar_select %p1051_p12, 1, 0 }
  0x12   : > { %s743_s27 = sshll.u32 %s966_s15, 10  ;;  %s716_s28 = sshll.u32 %s137_s26, 6 }
  0x13   : > { %s1060_s4 = scalar_lea.hbm %s1218_s0, %s743_s27  ;;  %s141_s5 = scalar_lea.vmem [#allocation2], %s716_s28 }
  0x14   : > { %s148_s6 = sshll.u32 %s141_s5, 4  ;;  %p1064_p13 = pnand %p815_p10, %p1036_p5  ;;  %s1068_s6 = int_to_ptr.vmem [resolvable:$true] %s148_s6 }
  0x15   : > { %s1070_s8 = scalar_lea.sflag [#allocation3], %s137_s26  ;;  %s874_s9 = scalar_lea.hbm %s1060_s4, 1024 }
  0x16   : > { %p875_p0 = scmp.ne.s32.totalorder %s1060_s4, %s874_s9  ;;  %p876_p1 = pneg %p1064_p13 }
  0x17   : > { %s879_s17 = scalar_lea.hbm %s1218_s0, 2048  ;;  %p880_p4 = scmp.lt.s32.totalorder %s1060_s4, %s1218_s0 }
  0x18   : > { %p877_p2 = pnand %p876_p1, %p875_p0  ;;  %p881_p5 = scmp.lt.s32.totalorder %s879_s17, %s874_s9 }
  0x1a   : > { %p878_p3 = pneg %p877_p2  ;;  %p882_p7 = por %p881_p5, %p880_p4 }
  0x1c   : > { %p883_p8 = pnand %p882_p7, %p878_p3 }
  0x1e   : > { %886 = shalt.err (!%p883_p8)
}
  0x1f   : > { %s887_s22 = scalar_lea.vmem %s1068_s6, 1024  ;;  %s968_s26 = smov [#allocation2]  }
  0x20   : > { %p888_p10 = scmp.ne.s32.totalorder %s1068_s6, %s887_s22  ;;  %s892_s27 = sshll.u32 %s968_s26, 4  ;;  %s893_s27 = int_to_ptr.vmem [resolvable:$false] %s892_s27 }
  0x21   : > { %s894_s28 = scalar_lea.vmem %s893_s27, 2048  ;;  %p895_p2 = scmp.lt.s32.totalorder %s1068_s6, %s893_s27 }
  0x22   : > { %p890_p9 = pnand %p888_p10, %p876_p1  ;;  %p896_p12 = scmp.lt.s32.totalorder %s894_s28, %s887_s22 }
  0x24   : > { %p891_p0 = pneg %p890_p9  ;;  %p897_p11 = por %p896_p12, %p895_p2 }
  0x26   : > { %p898_p6 = pnand %p897_p11, %p891_p0 }
  0x28   : > { %901 = shalt.err (!%p898_p6)
}
  0x29   : > { %s969_s29 = smov 256   ;;  %s970_s30 = smov 16  }
  0x2a   : > { %810 = dma.hbm_to_vmem [thread:$0]  (!%p1064_p13), %s1060_s4, 1024, %s1068_s6, %s1070_s8, %s969_s29, %s969_s29, %s970_s30  }
  0x2b   : > { %p719_p9 = scmp.ge.s32.totalorder %s966_s15, 1  ;;  %p156_p1 = scmp.lt.s32.totalorder %s966_s15, 3 }
  0x2d   : > { %p157_p3 = pnand %p719_p9, %p156_p1 }
  0x2e   : > { %s1094_s5 = sand.u32 (!%p157_p3), 1, %s958_s13   ;;  %p1229_p6 = scmp.ne.s32.totalorder (!%p157_p3), %s1225_s23, 0 }
  0x2f   : > { %160 = sbr.rel (%p157_p3) target bundleno = 783 (0x30f), region = 32  ;;  %s720_s9 = sshll.u32 (!%p157_p3), %s1094_s5, 6 }
  0x30   : > { %s163_s10 = scalar_lea.sflag (!%p157_p3), [#allocation3], %s1094_s5  ;;  %s166_s11 = scalar_lea.vmem (!%p157_p3), [#allocation2], %s720_s9 }
  0x34   : > { %945 = dma.done.wait (%p1229_p6), %s163_s10, 1024  }
  0x35   : > { %947 = vsyncadd (%p1229_p6), %s163_s10, 4294966272  ;;  %v1104_v0 = vld [vmem:[%s166_s11 + $0x30] sm:$0xff]  ;;  %v1106_v1 = vld [vmem:[%s166_s11 + $0x38] sm:$0xff]  ;;  %v971_v16 = vmov 0.0   ;;  %vm972_vm0 = vmmov 0   ;;  %vm226_vm1 = vcmask 261120  }
  0x36   : > { %v1108_v2 = vld [vmem:[%s166_s11 + $0x20] sm:$0xff]  ;;  %v206_v3 = vadd.f32 %v1106_v1, %v1104_v0  ;;  %v218_v4 = vmax.f32 %v1104_v0, %v1106_v1  ;;  %v1114_v5 = vld [vmem:[%s166_s11 + $0x28] sm:$0xff]  ;;  %v1116_v6 = vld [vmem:[%s166_s11 + $0x10] sm:$0xff]  ;;  %765 = vmatprep.subr.mxu0 %v971_v16  ;;  %776 = vmatprep.subr.mxu1 %v971_v16  ;;  %vm376_vm2 = vcmask 15360   ;;  %vm389_vm3 = vcmask 1041408   ;;  %s188_s27 = scalar_lea.vmem [#allocation5], %s720_s9 }
  0x37   : > { %v1118_v7 = vld [vmem:[%s166_s11 + $0x18] sm:$0xff]  ;;  %v203_v8 = vadd.f32 %v1114_v5, %v1108_v2  ;;  %v1124_v10 = vld [vmem:[%s166_s11] sm:$0xff]  ;;  %v1126_v11 = vld [vmem:[%s166_s11 + $0x8] sm:$0xff]  ;;  %v215_v12 = vmax.f32 %v1108_v2, %v1114_v5  ;;  %773 = vmatprep.mubr.msk.f32.mxu0 %vm972_vm0, %v971_v16  ;;  %784 = vmatprep.mubr.msk.f32.mxu1 %vm972_vm0, %v971_v16  ;;  %v973_v40 = vmov 0   ;;  %s640_s28 = sshll.u32 %s188_s27, 4  ;;  %s744_s29 = sshll.u32 %s1018_s16, 10  ;;  %s1168_s28 = int_to_ptr.vmem [resolvable:$true] %s640_s28 }
  0x38   : > { %207 = vadd.xlane.f32.xlu0 %v206_v3  ;;  %219 = vmax.xlane.f32.xlu1 %v218_v4  ;;  %v200_v9 = vadd.f32 %v1118_v7, %v1116_v6  ;;  %v197_v13 = vadd.f32 %v1126_v11, %v1124_v10  ;;  %v212_v14 = vmax.f32 %v1116_v6, %v1118_v7  ;;  %v225_v27 = vld [vmem:[%s1219_s1] sm:$0x3]  ;;  %v302_v34 = vld [vmem:[%s1220_s2 + $0x8] sm:$0xff]  ;;  %v303_v35 = vld [vmem:[%s1220_s2 + $0x10] sm:$0xff]  ;;  %s1173_s10 = scalar_lea.hbm %s1221_s3, %s744_s29  ;;  %s627_s16 = scalar_lea.sflag [#allocation4], %s1094_s5 }
  0x39   : > { %v209_v15 = vmax.f32 %v1124_v10, %v1126_v11  ;;  %v301_v30 = vld [vmem:[%s1220_s2] sm:$0xff]  ;;  %v304_v39 = vld [vmem:[%s1220_s2 + $0x18] sm:$0xff]  ;;  %857 = vset.pattern.permute.xlu1 %v973_v40  ;;  %856 = vset.pattern.permute.xlu0 %v973_v40  ;;  %s902_s11 = scalar_lea.vmem %s1168_s28, 1024  ;;  %p1230_p12 = scmp.ne.s32.totalorder %s1226_s24, 0 }
  0x3a   : > { %p903_p11 = scmp.ne.s32.totalorder %s1168_s28, %s902_s11  ;;  %s974_s23 = smov [#allocation5]  }
  0x3b   : > { %s906_s4 = sshll.u32 %s974_s23, 4  ;;  %s907_s4 = int_to_ptr.vmem [resolvable:$false] %s906_s4 }
  0x3c   : > { %204 = vadd.xlane.f32.xlu0 %v203_v8  ;;  %201 = vadd.xlane.f32.xlu1 %v200_v9  ;;  %p904_p13 = pnand %p903_p11, %p1230_p12  ;;  %s908_s6 = scalar_lea.vmem %s907_s4, 2048 }
  0x3d   : > { %p909_p5 = scmp.lt.s32.totalorder %s1168_s28, %s907_s4  ;;  %p910_p7 = scmp.lt.s32.totalorder %s908_s6, %s902_s11 }
  0x3e   : > { %p905_p4 = pneg %p904_p13 }
  0x3f   : > { %p911_p8 = por %p910_p7, %p909_p5 }
  0x40   : > { %216 = vmax.xlane.f32.xlu0 %v215_v12  ;;  %198 = vadd.xlane.f32.xlu1 %v197_v13 }
  0x41   : > { %p912_p10 = pnand %p911_p8, %p905_p4 }
  0x44   : > { %213 = vmax.xlane.f32.xlu0 %v212_v14  ;;  %210 = vmax.xlane.f32.xlu1 %v209_v15 }
  0xc1   : > { %v208_v17 = vpop.xlane.xlu0 %207  ;;  %v220_v18 = vpop.xlane.xlu1 %219 }
  0xc2   : > { %v224_v19 = vmul.f32 0.00390625, %v208_v17  ;;  %777 = vmatpush3.msra.mxu1 %v220_v18 }
  0xc3   : > { %778 = vmatprep.subr.mxu1 %v971_v16 }
  0xc4   : > { %766 = vmatpush3.msra.mxu0 %v224_v19 }
  0xc5   : > { %v205_v20 = vpop.xlane.xlu0 %204  ;;  %767 = vmatprep.subr.mxu0 %v971_v16  ;;  %v202_v21 = vpop.xlane.xlu1 %201 }
  0xc6   : > { %v223_v22 = vmul.f32 0.00390625, %v205_v20  ;;  %v222_v23 = vmul.f32 0.00390625, %v202_v21 }
  0xc8   : > { %768 = vmatpush3.msra.mxu0 %v223_v22 }
  0xc9   : > { %769 = vmatprep.subr.mxu0 %v971_v16  ;;  %v217_v24 = vpop.xlane.xlu0 %216  ;;  %v199_v25 = vpop.xlane.xlu1 %198 }
  0xca   : > { %770 = vmatpush3.msra.mxu0 %v222_v23  ;;  %779 = vmatpush3.msra.mxu1 %v217_v24  ;;  %v221_v26 = vmul.f32 0.00390625, %v199_v25 }
  0xcb   : > { %780 = vmatprep.subr.mxu1 %v971_v16  ;;  %771 = vmatprep.subr.mxu0 %v971_v16 }
  0xcc   : > { %772 = vmatpush3.msra.mxu0 %v221_v26 }
  0xcd   : > { %v214_v28 = vpop.xlane.xlu0 %213  ;;  %774 = vmatmul.mubr.msk.f32.vlgmr.msra.gmra.mxu0 %vm226_vm1, %v225_v27  ;;  %v211_v29 = vpop.xlane.xlu1 %210 }
  0xce   : > { %781 = vmatpush3.msra.mxu1 %v214_v28  ;;  %789 = vmatprep.mubr.msk.f32.mxu0 %vm376_vm2, %v301_v30 }
  0xcf   : > { %782 = vmatprep.subr.mxu1 %v971_v16 }
  0xd0   : > { %783 = vmatpush3.msra.mxu1 %v211_v29 }
  0xd1   : > { %785 = vmatmul.mubr.msk.f32.vlgmr.msra.gmra.mxu1 %vm226_vm1, %v225_v27 }
  0xd2   : > { %797 = vmatprep.mubr.msk.f32.mxu1 %vm376_vm2, %v301_v30 }
 0x18d   : > { %v296_v31 = vpop.f32.mrf.mxu0 }
 0x18e   : > { %v300_v32 = vmax.f32 %v296_v31, 0.0 }
 0x18f   : > { %v775_v33 = vpop.f32.mrf.mxu0 }
 0x190   : > { %795 = vmatprep.subr.msk.mxu1 %vm389_vm3, %v300_v32 }
 0x191   : > { %v371_v36 = vpop.f32.mrf.mxu1  ;;  %796 = vmatpush3.msk.msra.mxu1 %vm389_vm3, %v300_v32 }
 0x192   : > { %v375_v37 = vmax.f32 %v371_v36, 0.0  ;;  %798 = vmatmul.mubr.msk.f32.vlgmr.msra.gmra.mxu1 %vm376_vm2, %v302_v34 }
 0x193   : > { %v786_v38 = vpop.f32.mrf.mxu1  ;;  %800 = vmatprep.mubr.msk.f32.mxu1 %vm376_vm2, %v303_v35 }
 0x194   : > { %787 = vmatprep.subr.msk.mxu0 %vm389_vm3, %v375_v37 }
 0x195   : > { %788 = vmatpush3.msk.msra.mxu0 %vm389_vm3, %v375_v37 }
 0x196   : > { %790 = vmatmul.mubr.msk.f32.vlgmr.msra.gmra.mxu0 %vm376_vm2, %v302_v34  ;;  %801 = vmatmul.mubr.msk.f32.gmra.mxu1 %vm376_vm2, %v304_v39 }
 0x197   : > { %792 = vmatprep.mubr.msk.f32.mxu0 %vm376_vm2, %v303_v35 }
 0x19a   : > { %793 = vmatmul.mubr.msk.f32.gmra.mxu0 %vm376_vm2, %v304_v39 }
 0x252   : > { %v799_v41 = vpop.f32.mrf.mxu1 }
 0x254   : > { %v547_v42 = vpop.f32.mrf.mxu1 }
 0x256   : > { %v791_v43 = vpop.f32.mrf.mxu0  ;;  %v802_v46 = vpop.f32.mrf.mxu1 }
 0x257   : > { %v553_v44 = vadd.f32 %v799_v41, %v791_v43 }
 0x258   : > { %v459_v45 = vpop.f32.mrf.mxu0  ;;  %v557_v53 = vpop.f32.mrf.mxu1 }
 0x259   : > { %v735_v47 = vmul.f32 -1.442695, %v553_v44  ;;  %v548_v48 = vadd.f32 %v547_v42, %v459_v45 }
 0x25a   : > { %v794_v49 = vpop.f32.mrf.mxu0 }
 0x25b   : > { %858 = vpow2.f32 %v735_v47  ;;  %v734_v50 = vmul.f32 -1.442695, %v548_v48  ;;  %v563_v51 = vadd.f32 %v802_v46, %v794_v49 }
 0x25c   : > { %v469_v52 = vpop.f32.mrf.mxu0 }
 0x25d   : > { %860 = vpow2.f32 %v734_v50  ;;  %v737_v54 = vmul.f32 -1.442695, %v563_v51  ;;  %v558_v55 = vadd.f32 %v557_v53, %v469_v52 }
 0x25f   : > { %v736_v56 = vmul.f32 -1.442695, %v558_v55  ;;  %862 = vpow2.f32 %v737_v54 }
 0x261   : > { %864 = vpow2.f32 %v736_v56 }
 0x268   : > { %v859_v57 = vpop.eup %858 }
 0x269   : > { %v579_v58 = vadd.f32 1.0, %v859_v57 }
 0x26a   : > { %v861_v59 = vpop.eup %860 }
 0x26b   : > { %866 = vrcp.f32 %v579_v58  ;;  %v578_v60 = vadd.f32 1.0, %v861_v59 }
 0x26c   : > { %v863_v61 = vpop.eup %862 }
 0x26d   : > { %868 = vrcp.f32 %v578_v60  ;;  %v581_v3 = vadd.f32 1.0, %v863_v61 }
 0x26e   : > { %v865_v62 = vpop.eup %864 }
 0x26f   : > { %v580_v63 = vadd.f32 1.0, %v865_v62 }
 0x271   : > { %870 = vrcp.f32 %v580_v63 }
 0x272   : > { %872 = vrcp.f32 %v581_v3 }
 0x278   : > { %v867_v4 = vpop.eup %866 }
 0x279   : > { %597 = vperm.xlu1 %857, %v867_v4  }
 0x27a   : > { %v869_v8 = vpop.eup %868 }
 0x27b   : > { %592 = vperm.xlu0 %856, %v869_v8  }
 0x27e   : > { %v871_v9 = vpop.eup %870 }
 0x27f   : > { %602 = vperm.xlu1 %857, %v871_v9   ;;  %v873_v12 = vpop.eup %872 }
 0x283   : > { %607 = vperm.xlu1 %857, %v873_v12  }
 0x2f4   : > { %v598_v13 = vpop.permute.xlu1 %597 }
 0x2f5   : > { %v612_v14 = vmul.f32 %v598_v13, %v1116_v6  ;;  %v613_v15 = vmul.f32 %v598_v13, %v1118_v7 }
 0x2f6   : > { %v593_v16 = vpop.permute.xlu0 %592 }
 0x2f7   : > { %620 = vst [vmem:[%s188_s27 + $0x10] sm:$0xff] %v612_v14  ;;  %621 = vst [vmem:[%s188_s27 + $0x18] sm:$0xff] %v613_v15  ;;  %v610_v17 = vmul.f32 %v593_v16, %v1124_v10  ;;  %v611_v18 = vmul.f32 %v593_v16, %v1126_v11 }
 0x2f9   : > { %618 = vst [vmem:[%s188_s27] sm:$0xff] %v610_v17  ;;  %619 = vst [vmem:[%s188_s27 + $0x8] sm:$0xff] %v611_v18 }
 0x2fa   : > { %v603_v19 = vpop.permute.xlu1 %602 }
 0x2fb   : > { %v614_v20 = vmul.f32 %v603_v19, %v1108_v2  ;;  %v615_v6 = vmul.f32 %v603_v19, %v1114_v5 }
 0x2fd   : > { %622 = vst [vmem:[%s188_s27 + $0x20] sm:$0xff] %v614_v20  ;;  %623 = vst [vmem:[%s188_s27 + $0x28] sm:$0xff] %v615_v6 }
 0x2fe   : > { %v608_v7 = vpop.permute.xlu1 %607 }
 0x2ff   : > { %v616_v10 = vmul.f32 %v608_v7, %v1104_v0  ;;  %v617_v2 = vmul.f32 %v608_v7, %v1106_v1 }
 0x301   : > { %624 = vst [vmem:[%s188_s27 + $0x30] sm:$0xff] %v616_v10  ;;  %625 = vst [vmem:[%s188_s27 + $0x38] sm:$0xff] %v617_v2 }
 0x302   : > { %915 = shalt.err (!%p912_p10)
}
 0x303   : > { %s916_s7 = scalar_lea.hbm %s1173_s10, 1024  ;;  %s920_s19 = scalar_lea.hbm %s1221_s3, 2048 }
 0x304   : > { %p917_p0 = scmp.ne.s32.totalorder %s1173_s10, %s916_s7  ;;  %p921_p1 = scmp.lt.s32.totalorder %s1173_s10, %s1221_s3 }
 0x305   : > { %p922_p3 = scmp.lt.s32.totalorder %s920_s19, %s916_s7 }
 0x306   : > { %p918_p2 = pnand %p917_p0, %p1230_p12 }
 0x307   : > { %p923_p6 = por %p922_p3, %p921_p1 }
 0x308   : > { %p919_p9 = pneg %p918_p2 }
 0x30a   : > { %p924_p11 = pnand %p923_p6, %p919_p9 }
 0x30c   : > { %927 = shalt.err (!%p924_p11)
}
 0x30d   : > { %s975_s26 = smov 256   ;;  %s976_s27 = smov 16  }
 0x30e   : > { %805 = dma.vmem_to_hbm [thread:$0]  (%p1230_p12), %s1168_s28, 1024, %s1173_s10, %s627_s16, %s975_s26, %s975_s26, %s976_s27  }
 0x30f PF: > { %s655_s29 = sand.u32 1, %s954_s12   ;;  %p1231_p13 = scmp.ne.s32.totalorder %s1227_s25, 0 }
 0x310   : > { %p1232_p4 = scmp.ge.s32.totalorder %s966_s15, 2  ;;  %s656_s30 = scalar_lea.sflag [#allocation4], %s655_s29 }
 0x312   : > { %p812_p5 = pnand %p1232_p4, %p1231_p13 }
 0x314   : > { %p813_p7 = pneg %p812_p5 }
 0x316   : > { %949 = dma.done.wait (%p813_p7), %s656_s30, 1024  }
 0x317   : > { %951 = vsyncadd (%p813_p7), %s656_s30, 4294966272  ;;  %p16_p8 = scmp.ge.s32.totalorder %s1022_s18, 4   ;;  %s1233_s12 = smov %s958_s13 }
 0x318   : > { %s1234_s13 = smov %s962_s14  ;;  %s1235_s14 = smov %s1034_s21 }
 0x319   : > { %s1236_s15 = smov %s1022_s18  ;;  %18 = sbr.rel (!%p16_p8) target bundleno = 5 (0x5), region = 77 }
 0x31e   :  { %661 = vsyncpa [#allocation3], 1 }
 0x31f   :  { %663 = vsyncpa [#allocation3 + $0x1], 1 }
 0x320   :  { %664 = vsyncpa [#allocation4], 1 }
 0x321   :  { %666 = vsyncpa [#allocation4 + $0x1], 1 }

</bundles_post_ra>
